<compile_context>
chip_gen: v5e
topology: v5e:2x2
jax: 0.10.0
libtpu: 0.0.40
codegen_flags: <defaults>
</compile_context>

<pallas_src>
import functools

import jax
import jax.numpy as jnp
from jax.experimental import pallas as pl
from jax.experimental.pallas import tpu as pltpu


def _zero_conv2d_kernel(xp_ref, w_ref, b_ref, out_ref, xcol_ref, *, wp, hwp, c_in):
    """Channels-major ZeroConv2d for a block of `bn` images.

    xp_ref  : (bn, C_in, L)      flattened constant-1-padded images, L = (H+3)*Wp
    w_ref   : (C_out, 9*C_in)    tap-merged weights, pre-scaled by exp(3*scale)
    b_ref   : (C_out, 1)         bias, pre-scaled by exp(3*scale)
    out_ref : (bn, C_out, H*Wp)  lane-dense output (junk cols w in {W, W+1} trimmed outside)
    xcol_ref: (9*C_in, H*Wp)     VMEM im2col scratch
    """
    bn = xp_ref.shape[0]
    w = w_ref[...]
    b = b_ref[...].astype(jnp.float32)            # (C_out, 1) broadcasts over lanes

    for i in range(bn):                            # static, small per-step batch block
        xp = xp_ref[i]                             # (C_in, L): ~3 dense vregs at demo sizes
        # In-VMEM im2col: 9 lane-shifted windows stacked along the contraction dim.
        for kh in range(3):
            for kw in range(3):
                t = 3 * kh + kw
                off = kh * wp + kw
                xcol_ref[t * c_in:(t + 1) * c_in, :] = xp[:, off:off + hwp]
        # Single MXU matmul per image: (C_out, 9*C_in) @ (9*C_in, H*Wp) -> f32.
        acc = jnp.dot(w, xcol_ref[...], preferred_element_type=jnp.float32) + b
        out_ref[i] = acc.astype(out_ref.dtype)     # lane-dense store, no transpose


def zero_conv2d(x, weight, bias, scale, *, block_n=None):
    """x: (N, C_in, H, W); weight: (C_out, C_in, 3, 3); bias: (C_out,);
    scale: (1, C_out, 1, 1).  Returns (N, C_out, H, W) — same as PyTorch."""
    N, C_in, H, W = x.shape
    C_out = weight.shape[0]
    Wp = W + 2
    hwp = H * Wp                   # flattened output positions per image (Wp-strided rows)
    L = (H + 3) * Wp               # padded-flat length; the extra (3rd) bottom pad row is the
                                   # halo so the largest tap offset (2*Wp+2) stays in bounds,
                                   # and it only ever feeds the trimmed junk columns.

    # --- wrapper glue: single constant-1 pad (channels-major, so no transpose) ---
    xp = jnp.pad(x, ((0, 0), (0, 0), (1, 2), (1, 1)), constant_values=1.0)
    xp_flat = xp.reshape(N, C_in, L)               # contiguous -> free reshape

    # Fold exp(3*scale) into the (tiny) conv parameters; tap-major weight layout
    # matching the im2col row order (row index = (3*kh + kw)*C_in + ci).
    s = jnp.exp(scale.reshape(C_out).astype(jnp.float32) * 3.0)                # (C_out,)
    w_eff = (jnp.transpose(weight, (0, 2, 3, 1)).astype(jnp.float32)
             * s[:, None, None, None]).reshape(C_out, 9 * C_in).astype(x.dtype)
    b_eff = (bias.astype(jnp.float32) * s).reshape(C_out, 1)

    # --- batch block size: largest divisor of N whose double-buffered blocks fit
    #     comfortably in the smallest (v5e, 16 MiB) default scoped-VMEM budget ---
    itemsize = jnp.dtype(x.dtype).itemsize
    per_img = (C_in * L + C_out * hwp) * itemsize
    if block_n is None:
        budget = 8 * 1024 * 1024
        block_n = 1
        for d in range(1, N + 1):
            if N % d == 0 and 2 * d * per_img <= budget:
                block_n = d
    assert N % block_n == 0, "block_n must divide the batch size"
    grid = (N // block_n,)

    # Only raise the scoped-VMEM limit if the working set actually needs it.
    vmem_needed = (2 * block_n * per_img + 9 * C_in * hwp * itemsize
                   + (w_eff.size + b_eff.size) * 4 + (1 << 20))
    vmem_limit = int(min(vmem_needed, 60 * 1024 * 1024)) if vmem_needed > (16 << 20) else None

    cost = pl.CostEstimate(
        flops=2 * N * hwp * 9 * C_in * C_out,
        transcendentals=0,
        bytes_accessed=(N * C_in * L * itemsize
                        + w_eff.size * itemsize + b_eff.size * 4
                        + N * C_out * hwp * itemsize),
    )

    kernel = functools.partial(_zero_conv2d_kernel, wp=Wp, hwp=hwp, c_in=C_in)
    out_ext = pl.pallas_call(
        kernel,
        out_shape=jax.ShapeDtypeStruct((N, C_out, hwp), x.dtype),
        grid_spec=pltpu.PrefetchScalarGridSpec(
            num_scalar_prefetch=0,
            grid=grid,
            in_specs=[
                pl.BlockSpec((block_n, C_in, L), lambda n: (n, 0, 0)),
                pl.BlockSpec((C_out, 9 * C_in), lambda n: (0, 0)),
                pl.BlockSpec((C_out, 1), lambda n: (0, 0)),
            ],
            out_specs=pl.BlockSpec((block_n, C_out, hwp), lambda n: (n, 0, 0)),
            scratch_shapes=[pltpu.VMEM((9 * C_in, hwp), x.dtype)],
        ),
        compiler_params=pltpu.CompilerParams(
            dimension_semantics=("parallel",),
            vmem_limit_bytes=vmem_limit),
        cost_estimate=cost,
    )(xp_flat, w_eff, b_eff)

    # (N, C_out, H*Wp) -> (N, C_out, H, Wp) -> drop the 2 junk columns -> NCHW.
    # (The final slice is tiny and fuses into the consumer under jit.)
    return out_ext.reshape(N, C_out, H, Wp)[:, :, :, :W]


def _reference(x_nchw, weight, bias, scale):
    """Plain-JAX reference of the PyTorch forward (for correctness checking)."""
    xp = jnp.pad(x_nchw, ((0, 0), (0, 0), (1, 1), (1, 1)), constant_values=1.0)
    out = jax.lax.conv_general_dilated(
        xp, weight, window_strides=(1, 1), padding="VALID",
        dimension_numbers=("NCHW", "OIHW", "NCHW"))
    out = out + bias.reshape(1, -1, 1, 1)
    return out * jnp.exp(scale * 3.0)


if __name__ == "__main__":
    key = jax.random.PRNGKey(0)
    N, C_in, C_out, H, W = 2, 4, 8, 16, 16
    x = jax.random.normal(key, (N, C_in, H, W), dtype=jnp.float32)

    # Parameters exactly as ZeroConv2d.__init__: all zero-initialized.
    weight = jnp.zeros((C_out, C_in, 3, 3), dtype=jnp.float32)
    bias = jnp.zeros((C_out,), dtype=jnp.float32)
    scale = jnp.zeros((1, C_out, 1, 1), dtype=jnp.float32)

    out = zero_conv2d(x, weight, bias, scale)
    jax.block_until_ready(out)
    assert out.shape == (N, C_out, H, W)
    ref = _reference(x, weight, bias, scale)
    assert jnp.allclose(out, ref, atol=1e-5), "mismatch with zero-init params"

    # Extra correctness check of the kernel math with nonzero (deterministic) params.
    k1, k2, k3 = jax.random.split(jax.random.PRNGKey(1), 3)
    w_nz = 0.1 * jax.random.normal(k1, (C_out, C_in, 3, 3), dtype=jnp.float32)
    b_nz = 0.1 * jax.random.normal(k2, (C_out,), dtype=jnp.float32)
    s_nz = 0.1 * jax.random.normal(k3, (1, C_out, 1, 1), dtype=jnp.float32)
    out_nz = zero_conv2d(x, w_nz, b_nz, s_nz)
    ref_nz = _reference(x, w_nz, b_nz, s_nz)
    jax.block_until_ready(out_nz)
    assert jnp.allclose(out_nz, ref_nz, atol=1e-4), "mismatch with nonzero params"

    print("KERNEL_OK")
</pallas_src>

<mosaic_0001>
module attributes {stable_mosaic.version = 11 : i64} {
  func.func @_zero_conv2d_kernel(%arg0: i32, %arg1: memref<2x4x342xf32, #tpu.memory_space<vmem>>, %arg2: memref<8x36xf32, #tpu.memory_space<vmem>>, %arg3: memref<8x1xf32, #tpu.memory_space<vmem>>, %arg4: memref<2x8x288xf32, #tpu.memory_space<vmem>>, %arg5: memref<36x288xf32, #tpu.memory_space<vmem>>) attributes {dimension_semantics = [#tpu.dimension_semantics<parallel>], iteration_bounds = array<i64: 1>, scalar_prefetch = 0 : i64, scratch_operands = 1 : i64, tpu.core_type = #tpu.core_type<tc>, window_params = [{transform_indices = @transform_0, window_bounds = array<i64: 2, 4, 342>}, {pipeline_mode = #tpu.pipeline_mode<synchronous>, transform_indices = @transform_1, window_bounds = array<i64: 8, 36>}, {pipeline_mode = #tpu.pipeline_mode<synchronous>, transform_indices = @transform_2, window_bounds = array<i64: 8, 1>}, {transform_indices = @transform_3, window_bounds = array<i64: 2, 8, 288>}]} {
    %c0 = arith.constant 0 : index
    %c0_0 = arith.constant 0 : index
    %0 = vector.load %arg2[%c0, %c0_0] : memref<8x36xf32, #tpu.memory_space<vmem>>, vector<8x36xf32>
    %c0_1 = arith.constant 0 : index
    %c0_2 = arith.constant 0 : index
    %1 = vector.load %arg3[%c0_1, %c0_2] : memref<8x1xf32, #tpu.memory_space<vmem>>, vector<8x1xf32>
    %c0_3 = arith.constant 0 : index
    %c0_4 = arith.constant 0 : index
    %c0_5 = arith.constant 0 : index
    %2 = vector.load %arg1[%c0_3, %c0_4, %c0_5] : memref<2x4x342xf32, #tpu.memory_space<vmem>>, vector<1x4x342xf32>
    %3 = vector.shape_cast %2 : vector<1x4x342xf32> to vector<4x342xf32>
    %4 = vector.extract_strided_slice %3 {offsets = [0, 0], sizes = [4, 288], strides = [1, 1]} : vector<4x342xf32> to vector<4x288xf32>
    %c0_6 = arith.constant 0 : index
    %c0_7 = arith.constant 0 : index
    %5 = vector.load %arg5[%c0_6, %c0_7] : memref<36x288xf32, #tpu.memory_space<vmem>>, vector<4x288xf32>
    tpu.vector_store %arg5[%c0_6, %c0_7], %4 {strides = array<i32>} : memref<36x288xf32, #tpu.memory_space<vmem>>, vector<4x288xf32>,
    %6 = vector.extract_strided_slice %3 {offsets = [0, 1], sizes = [4, 288], strides = [1, 1]} : vector<4x342xf32> to vector<4x288xf32>
    %c4 = arith.constant 4 : index
    %c0_8 = arith.constant 0 : index
    %7 = vector.load %arg5[%c4, %c0_8] : memref<36x288xf32, #tpu.memory_space<vmem>>, vector<4x288xf32>
    tpu.vector_store %arg5[%c4, %c0_8], %6 {strides = array<i32>} : memref<36x288xf32, #tpu.memory_space<vmem>>, vector<4x288xf32>,
    %8 = vector.extract_strided_slice %3 {offsets = [0, 2], sizes = [4, 288], strides = [1, 1]} : vector<4x342xf32> to vector<4x288xf32>
    %c8 = arith.constant 8 : index
    %c0_9 = arith.constant 0 : index
    %9 = vector.load %arg5[%c8, %c0_9] : memref<36x288xf32, #tpu.memory_space<vmem>>, vector<4x288xf32>
    tpu.vector_store %arg5[%c8, %c0_9], %8 {strides = array<i32>} : memref<36x288xf32, #tpu.memory_space<vmem>>, vector<4x288xf32>,
    %10 = vector.extract_strided_slice %3 {offsets = [0, 18], sizes = [4, 288], strides = [1, 1]} : vector<4x342xf32> to vector<4x288xf32>
    %c12 = arith.constant 12 : index
    %c0_10 = arith.constant 0 : index
    %11 = vector.load %arg5[%c12, %c0_10] : memref<36x288xf32, #tpu.memory_space<vmem>>, vector<4x288xf32>
    tpu.vector_store %arg5[%c12, %c0_10], %10 {strides = array<i32>} : memref<36x288xf32, #tpu.memory_space<vmem>>, vector<4x288xf32>,
    %12 = vector.extract_strided_slice %3 {offsets = [0, 19], sizes = [4, 288], strides = [1, 1]} : vector<4x342xf32> to vector<4x288xf32>
    %c16 = arith.constant 16 : index
    %c0_11 = arith.constant 0 : index
    %13 = vector.load %arg5[%c16, %c0_11] : memref<36x288xf32, #tpu.memory_space<vmem>>, vector<4x288xf32>
    tpu.vector_store %arg5[%c16, %c0_11], %12 {strides = array<i32>} : memref<36x288xf32, #tpu.memory_space<vmem>>, vector<4x288xf32>,
    %14 = vector.extract_strided_slice %3 {offsets = [0, 20], sizes = [4, 288], strides = [1, 1]} : vector<4x342xf32> to vector<4x288xf32>
    %c20 = arith.constant 20 : index
    %c0_12 = arith.constant 0 : index
    %15 = vector.load %arg5[%c20, %c0_12] : memref<36x288xf32, #tpu.memory_space<vmem>>, vector<4x288xf32>
    tpu.vector_store %arg5[%c20, %c0_12], %14 {strides = array<i32>} : memref<36x288xf32, #tpu.memory_space<vmem>>, vector<4x288xf32>,
    %16 = vector.extract_strided_slice %3 {offsets = [0, 36], sizes = [4, 288], strides = [1, 1]} : vector<4x342xf32> to vector<4x288xf32>
    %c24 = arith.constant 24 : index
    %c0_13 = arith.constant 0 : index
    %17 = vector.load %arg5[%c24, %c0_13] : memref<36x288xf32, #tpu.memory_space<vmem>>, vector<4x288xf32>
    tpu.vector_store %arg5[%c24, %c0_13], %16 {strides = array<i32>} : memref<36x288xf32, #tpu.memory_space<vmem>>, vector<4x288xf32>,
    %18 = vector.extract_strided_slice %3 {offsets = [0, 37], sizes = [4, 288], strides = [1, 1]} : vector<4x342xf32> to vector<4x288xf32>
    %c28 = arith.constant 28 : index
    %c0_14 = arith.constant 0 : index
    %19 = vector.load %arg5[%c28, %c0_14] : memref<36x288xf32, #tpu.memory_space<vmem>>, vector<4x288xf32>
    tpu.vector_store %arg5[%c28, %c0_14], %18 {strides = array<i32>} : memref<36x288xf32, #tpu.memory_space<vmem>>, vector<4x288xf32>,
    %20 = vector.extract_strided_slice %3 {offsets = [0, 38], sizes = [4, 288], strides = [1, 1]} : vector<4x342xf32> to vector<4x288xf32>
    %c32 = arith.constant 32 : index
    %c0_15 = arith.constant 0 : index
    %21 = vector.load %arg5[%c32, %c0_15] : memref<36x288xf32, #tpu.memory_space<vmem>>, vector<4x288xf32>
    tpu.vector_store %arg5[%c32, %c0_15], %20 {strides = array<i32>} : memref<36x288xf32, #tpu.memory_space<vmem>>, vector<4x288xf32>,
    %c0_16 = arith.constant 0 : index
    %c0_17 = arith.constant 0 : index
    %22 = vector.load %arg5[%c0_16, %c0_17] : memref<36x288xf32, #tpu.memory_space<vmem>>, vector<36x288xf32>
    %cst = arith.constant dense<0.000000e+00> : vector<8x288xf32>
    %23 = tpu.matmul %0, %22, %cst {dimension_numbers = #tpu.dot_dimension_numbers<[1], [0], [0], [1], [0, 0, 1, 1], [], []>} : vector<8x36xf32>, vector<36x288xf32>, vector<8x288xf32> -> vector<8x288xf32>
    %24 = vector.broadcast %1 : vector<8x1xf32> to vector<8x288xf32>
    %25 = arith.addf %23, %24 : vector<8x288xf32>
    %c0_18 = arith.constant 0 : index
    %c0_19 = arith.constant 0 : index
    %c0_20 = arith.constant 0 : index
    %26 = vector.load %arg4[%c0_18, %c0_19, %c0_20] : memref<2x8x288xf32, #tpu.memory_space<vmem>>, vector<1x8x288xf32>
    %27 = vector.shape_cast %26 : vector<1x8x288xf32> to vector<8x288xf32>
    %28 = vector.shape_cast %25 : vector<8x288xf32> to vector<1x8x288xf32>
    tpu.vector_store %arg4[%c0_18, %c0_19, %c0_20], %28 {strides = array<i32>} : memref<2x8x288xf32, #tpu.memory_space<vmem>>, vector<1x8x288xf32>,
    %c1 = arith.constant 1 : index
    %c0_21 = arith.constant 0 : index
    %c0_22 = arith.constant 0 : index
    %29 = vector.load %arg1[%c1, %c0_21, %c0_22] : memref<2x4x342xf32, #tpu.memory_space<vmem>>, vector<1x4x342xf32>
    %30 = vector.shape_cast %29 : vector<1x4x342xf32> to vector<4x342xf32>
    %31 = vector.extract_strided_slice %30 {offsets = [0, 0], sizes = [4, 288], strides = [1, 1]} : vector<4x342xf32> to vector<4x288xf32>
    %c0_23 = arith.constant 0 : index
    %c0_24 = arith.constant 0 : index
    %32 = vector.load %arg5[%c0_23, %c0_24] : memref<36x288xf32, #tpu.memory_space<vmem>>, vector<4x288xf32>
    tpu.vector_store %arg5[%c0_23, %c0_24], %31 {strides = array<i32>} : memref<36x288xf32, #tpu.memory_space<vmem>>, vector<4x288xf32>,
    %33 = vector.extract_strided_slice %30 {offsets = [0, 1], sizes = [4, 288], strides = [1, 1]} : vector<4x342xf32> to vector<4x288xf32>
    %c4_25 = arith.constant 4 : index
    %c0_26 = arith.constant 0 : index
    %34 = vector.load %arg5[%c4_25, %c0_26] : memref<36x288xf32, #tpu.memory_space<vmem>>, vector<4x288xf32>
    tpu.vector_store %arg5[%c4_25, %c0_26], %33 {strides = array<i32>} : memref<36x288xf32, #tpu.memory_space<vmem>>, vector<4x288xf32>,
    %35 = vector.extract_strided_slice %30 {offsets = [0, 2], sizes = [4, 288], strides = [1, 1]} : vector<4x342xf32> to vector<4x288xf32>
    %c8_27 = arith.constant 8 : index
    %c0_28 = arith.constant 0 : index
    %36 = vector.load %arg5[%c8_27, %c0_28] : memref<36x288xf32, #tpu.memory_space<vmem>>, vector<4x288xf32>
    tpu.vector_store %arg5[%c8_27, %c0_28], %35 {strides = array<i32>} : memref<36x288xf32, #tpu.memory_space<vmem>>, vector<4x288xf32>,
    %37 = vector.extract_strided_slice %30 {offsets = [0, 18], sizes = [4, 288], strides = [1, 1]} : vector<4x342xf32> to vector<4x288xf32>
    %c12_29 = arith.constant 12 : index
    %c0_30 = arith.constant 0 : index
    %38 = vector.load %arg5[%c12_29, %c0_30] : memref<36x288xf32, #tpu.memory_space<vmem>>, vector<4x288xf32>
    tpu.vector_store %arg5[%c12_29, %c0_30], %37 {strides = array<i32>} : memref<36x288xf32, #tpu.memory_space<vmem>>, vector<4x288xf32>,
    %39 = vector.extract_strided_slice %30 {offsets = [0, 19], sizes = [4, 288], strides = [1, 1]} : vector<4x342xf32> to vector<4x288xf32>
    %c16_31 = arith.constant 16 : index
    %c0_32 = arith.constant 0 : index
    %40 = vector.load %arg5[%c16_31, %c0_32] : memref<36x288xf32, #tpu.memory_space<vmem>>, vector<4x288xf32>
    tpu.vector_store %arg5[%c16_31, %c0_32], %39 {strides = array<i32>} : memref<36x288xf32, #tpu.memory_space<vmem>>, vector<4x288xf32>,
    %41 = vector.extract_strided_slice %30 {offsets = [0, 20], sizes = [4, 288], strides = [1, 1]} : vector<4x342xf32> to vector<4x288xf32>
    %c20_33 = arith.constant 20 : index
    %c0_34 = arith.constant 0 : index
    %42 = vector.load %arg5[%c20_33, %c0_34] : memref<36x288xf32, #tpu.memory_space<vmem>>, vector<4x288xf32>
    tpu.vector_store %arg5[%c20_33, %c0_34], %41 {strides = array<i32>} : memref<36x288xf32, #tpu.memory_space<vmem>>, vector<4x288xf32>,
    %43 = vector.extract_strided_slice %30 {offsets = [0, 36], sizes = [4, 288], strides = [1, 1]} : vector<4x342xf32> to vector<4x288xf32>
    %c24_35 = arith.constant 24 : index
    %c0_36 = arith.constant 0 : index
    %44 = vector.load %arg5[%c24_35, %c0_36] : memref<36x288xf32, #tpu.memory_space<vmem>>, vector<4x288xf32>
    tpu.vector_store %arg5[%c24_35, %c0_36], %43 {strides = array<i32>} : memref<36x288xf32, #tpu.memory_space<vmem>>, vector<4x288xf32>,
    %45 = vector.extract_strided_slice %30 {offsets = [0, 37], sizes = [4, 288], strides = [1, 1]} : vector<4x342xf32> to vector<4x288xf32>
    %c28_37 = arith.constant 28 : index
    %c0_38 = arith.constant 0 : index
    %46 = vector.load %arg5[%c28_37, %c0_38] : memref<36x288xf32, #tpu.memory_space<vmem>>, vector<4x288xf32>
    tpu.vector_store %arg5[%c28_37, %c0_38], %45 {strides = array<i32>} : memref<36x288xf32, #tpu.memory_space<vmem>>, vector<4x288xf32>,
    %47 = vector.extract_strided_slice %30 {offsets = [0, 38], sizes = [4, 288], strides = [1, 1]} : vector<4x342xf32> to vector<4x288xf32>
    %c32_39 = arith.constant 32 : index
    %c0_40 = arith.constant 0 : index
    %48 = vector.load %arg5[%c32_39, %c0_40] : memref<36x288xf32, #tpu.memory_space<vmem>>, vector<4x288xf32>
    tpu.vector_store %arg5[%c32_39, %c0_40], %47 {strides = array<i32>} : memref<36x288xf32, #tpu.memory_space<vmem>>, vector<4x288xf32>,
    %c0_41 = arith.constant 0 : index
    %c0_42 = arith.constant 0 : index
    %49 = vector.load %arg5[%c0_41, %c0_42] : memref<36x288xf32, #tpu.memory_space<vmem>>, vector<36x288xf32>
    %cst_43 = arith.constant dense<0.000000e+00> : vector<8x288xf32>
    %50 = tpu.matmul %0, %49, %cst_43 {dimension_numbers = #tpu.dot_dimension_numbers<[1], [0], [0], [1], [0, 0, 1, 1], [], []>} : vector<8x36xf32>, vector<36x288xf32>, vector<8x288xf32> -> vector<8x288xf32>
    %51 = vector.broadcast %1 : vector<8x1xf32> to vector<8x288xf32>
    %52 = arith.addf %50, %51 : vector<8x288xf32>
    %c1_44 = arith.constant 1 : index
    %c0_45 = arith.constant 0 : index
    %c0_46 = arith.constant 0 : index
    %53 = vector.load %arg4[%c1_44, %c0_45, %c0_46] : memref<2x8x288xf32, #tpu.memory_space<vmem>>, vector<1x8x288xf32>
    %54 = vector.shape_cast %53 : vector<1x8x288xf32> to vector<8x288xf32>
    %55 = vector.shape_cast %52 : vector<8x288xf32> to vector<1x8x288xf32>
    tpu.vector_store %arg4[%c1_44, %c0_45, %c0_46], %55 {strides = array<i32>} : memref<2x8x288xf32, #tpu.memory_space<vmem>>, vector<1x8x288xf32>,
    return
  }
  func.func @transform_0(%arg0: i32) -> (i32, i32, i32) {
    %c0_i32 = arith.constant 0 : i32
    %c0_i32_0 = arith.constant 0 : i32
    %c0_i32_1 = arith.constant 0 : i32
    return %arg0, %c0_i32, %c0_i32_0 : i32, i32, i32
  }
  func.func @transform_1(%arg0: i32) -> (i32, i32) {
    %c0_i32 = arith.constant 0 : i32
    %c0_i32_0 = arith.constant 0 : i32
    %c0_i32_1 = arith.constant 0 : i32
    return %c0_i32, %c0_i32_0 : i32, i32
  }
  func.func @transform_2(%arg0: i32) -> (i32, i32) {
    %c0_i32 = arith.constant 0 : i32
    %c0_i32_0 = arith.constant 0 : i32
    %c0_i32_1 = arith.constant 0 : i32
    return %c0_i32, %c0_i32_0 : i32, i32
  }
  func.func @transform_3(%arg0: i32) -> (i32, i32, i32) {
    %c0_i32 = arith.constant 0 : i32
    %c0_i32_0 = arith.constant 0 : i32
    %c0_i32_1 = arith.constant 0 : i32
    return %arg0, %c0_i32, %c0_i32_0 : i32, i32, i32
  }
}

</mosaic_0001>

<bundles_post_ra>
// kernel: tpu_custom_call.1
= control target key start
LH: loop header
LB: loop body
LE: loop exit
PB: predicated region body
PF: predicated region fallthrough
CT: control target
= control target key end

     0   :  { %8 = vsyncpa [#allocation4], 0  ;;  %s937_s0 = inlined_call_operand.hbm [shape: f32[2,4,342], index: 0, kind: input, shape index: {}]   ;;  %s938_s1 = inlined_call_operand.vmem [shape: f32[8,36], index: 1, kind: input, shape index: {}]   ;;  %s939_s2 = inlined_call_operand.vmem [shape: f32[8,1], index: 2, kind: input, shape index: {}]   ;;  %s940_s3 = inlined_call_operand.hbm [shape: f32[2,8,288], index: 3, kind: output, shape index: {}]  }
   0x1   :  { %9 = vsyncpa [#allocation5], 0  ;;  %s14_s14 = sshll.u32 %s937_s0, 4  ;;  %s689_s15 = smov [#allocation3]   ;;  %s15_s14 = int_to_ptr.hbm [resolvable:$true] %s14_s14 }
   0x2   :  { %s16_s16 = sshll.u32 %s689_s15, 4  ;;  %s690_s17 = smov 192   ;;  %s17_s16 = int_to_ptr.vmem [resolvable:$true] %s16_s16 }
   0x3   :  { %s691_s18 = smov 12  }
   0x4   :  { %22 = dma.hbm_to_vmem [thread:$0]  %s15_s14, 384, %s17_s16, [#allocation4], %s690_s17, %s690_s17, %s691_s18  }
   0x5   :  { %685 = dma.done.wait [#allocation4], 384  }
   0x6   :  { %686 = vsyncadd [#allocation4], 4294966912  ;;  %v727_v0 = vld [vmem:[#allocation3] sm:$0xff]  ;;  %v729_v1 = vld [vmem:[#allocation3 + $0x8] sm:$0xf]  ;;  %s692_s0 = smov 127  }
   0x7   :  { %37 = vst [vmem:[#allocation1] ss:$2 sm:$0xff] %v727_v0  ;;  %s693_s19 = smov 126   ;;  %s694_s20 = smov 110   ;;  %v769_v26 = vld [vmem:[#allocation3 + $0xc] sm:$0xff]  ;;  %vm48_vm0 = vcmask 257024  }
   0x8   :  { %39 = vst [vmem:[#allocation1 + $0x10] ss:$2 sm:$0xff] %v729_v1  ;;  %s695_s21 = smov 109   ;;  %s696_s22 = smov 108   ;;  %v774_v29 = vld [vmem:[#allocation3 + $0x14] sm:$0xf] }
   0x9   :  { %s697_s23 = smov 92   ;;  %s698_s24 = smov 91   ;;  %vm63_vm1 = vcmask 1039360   ;;  %vm85_vm2 = vcmask 1031168   ;;  %vm71_vm3 = vcmask 261124   ;;  %vm107_vm4 = vcmask 900096  }
   0xa   :  { %s699_s25 = smov 90   ;;  %vm128_vm5 = vcmask 891904   ;;  %vm193_vm6 = vcmask 744448   ;;  %vm150_vm7 = vcmask 883712   ;;  %vm247_vm8 = vcmask 1043456   ;;  %s596_s5 = sshll.u32 %s940_s3, 4  ;;  %s597_s5 = int_to_ptr.hbm [resolvable:$true] %s596_s5 }
   0xb   :  { %vm171_vm9 = vcmask 752640   ;;  %vm214_vm10 = vcmask 736256   ;;  %vm243_vm11 = vcmask 293888   ;;  %vm319_vm12 = vcmask 261120   ;;  %s702_s6 = smov 384   ;;  %s703_s7 = smov 24  }
   0xe   :  { %v40_v2 = vld.sshfl [vmem:[#allocation1] sm:$0xff pattern:$0x75316420]  ;;  %v41_v3 = vld.sshfl [vmem:[#allocation1 + $0x8] sm:$0xff pattern:$0x75316420] }
   0xf   :  { %51 = vst [vmem:[#allocation1 + $0x1] ss:$2 sm:$0xff] %v727_v0  ;;  %v734_v4 = vld.sshfl [vmem:[#allocation1 + $0x10] sm:$0xff pattern:$0x75316420] }
  0x10   :  { %46 = vst [vmem:[#allocation2] sm:$0xf] %v40_v2 }
  0x11   :  { %47 = vst [vmem:[#allocation2 + $0x8] sm:$0xf] %v41_v3 }
  0x12   :  { %53 = vst [vmem:[#allocation1 + $0x11] ss:$2 sm:$0xff] %v729_v1 }
  0x13   :  { %49 = vst.msk [vmem:[#allocation2 + $0x10] sm:$0xf] %vm48_vm0, %v734_v4 }
  0x16   :  { %v55_v5 = vld.sshfl [vmem:[#allocation1 + $0x8] sm:$0xff pattern:$0x75316420]  ;;  %v54_v6 = vld.sshfl [vmem:[#allocation1] sm:$0xff pattern:$0x75316420] }
  0x17   :  { %59 = vrot.lane.b32.xlu1 %v55_v5, %s692_s0  ;;  %57 = vrot.lane.b32.xlu0 %v54_v6, %s692_s0  ;;  %73 = vst [vmem:[#allocation1] ss:$2 sm:$0xff] %v727_v0 }
  0x19   :  { %v56_v7 = vld.sshfl [vmem:[#allocation1 + $0x10] sm:$0xff pattern:$0x75316420] }
  0x1a   :  { %75 = vst [vmem:[#allocation1 + $0x10] ss:$2 sm:$0xff] %v729_v1 }
  0x1e   :  { %v76_v8 = vld.sshfl [vmem:[#allocation1] sm:$0xff pattern:$0x75316420]  ;;  %v77_v9 = vld.sshfl [vmem:[#allocation1 + $0x8] sm:$0xff pattern:$0x75316420] }
  0x1f   :  { %61 = vrot.lane.b32.xlu0 %v56_v7, %s692_s0  ;;  %79 = vrot.lane.b32.xlu1 %v76_v8, %s693_s19  ;;  %95 = vst [vmem:[#allocation1 + $0x1] ss:$2 sm:$0xff] %v727_v0 }
  0x20   :  { %81 = vrot.lane.b32.xlu2 %v77_v9, %s693_s19 }
  0x21   :  { %v78_v10 = vld.sshfl [vmem:[#allocation1 + $0x10] sm:$0xff pattern:$0x75316420] }
  0x22   :  { %97 = vst [vmem:[#allocation1 + $0x11] ss:$2 sm:$0xff] %v729_v1 }
  0x26   :  { %v99_v11 = vld.sshfl [vmem:[#allocation1 + $0x8] sm:$0xff pattern:$0x75316420]  ;;  %v98_v12 = vld.sshfl [vmem:[#allocation1] sm:$0xff pattern:$0x75316420] }
  0x27   :  { %83 = vrot.lane.b32.xlu0 %v78_v10, %s693_s19  ;;  %103 = vrot.lane.b32.xlu1 %v99_v11, %s694_s20  ;;  %116 = vst [vmem:[#allocation1] ss:$2 sm:$0xff] %v727_v0 }
  0x29   :  { %v100_v13 = vld.sshfl [vmem:[#allocation1 + $0x10] sm:$0xff pattern:$0x75316420] }
  0x2a   :  { %118 = vst [vmem:[#allocation1 + $0x10] ss:$2 sm:$0xff] %v729_v1 }
  0x2e   :  { %v120_v14 = vld.sshfl [vmem:[#allocation1 + $0x8] sm:$0xff pattern:$0x75316420]  ;;  %v119_v15 = vld.sshfl [vmem:[#allocation1] sm:$0xff pattern:$0x75316420] }
  0x2f   :  { %105 = vrot.lane.b32.xlu1 %v100_v13, %s694_s20  ;;  %101 = vrot.lane.b32.xlu0 %v98_v12, %s694_s20  ;;  %138 = vst [vmem:[#allocation1 + $0x1] ss:$2 sm:$0xff] %v727_v0 }
  0x31   :  { %v121_v16 = vld.sshfl [vmem:[#allocation1 + $0x10] sm:$0xff pattern:$0x75316420] }
  0x32   :  { %140 = vst [vmem:[#allocation1 + $0x11] ss:$2 sm:$0xff] %v729_v1 }
  0x36   :  { %v141_v17 = vld.sshfl [vmem:[#allocation1] sm:$0xff pattern:$0x75316420]  ;;  %v142_v18 = vld.sshfl [vmem:[#allocation1 + $0x8] sm:$0xff pattern:$0x75316420] }
  0x37   :  { %124 = vrot.lane.b32.xlu1 %v120_v14, %s695_s21  ;;  %122 = vrot.lane.b32.xlu0 %v119_v15, %s695_s21  ;;  %159 = vst [vmem:[#allocation1] ss:$2 sm:$0xff] %v727_v0 }
  0x38   :  { %144 = vrot.lane.b32.xlu2 %v141_v17, %s696_s22 }
  0x39   :  { %v143_v19 = vld.sshfl [vmem:[#allocation1 + $0x10] sm:$0xff pattern:$0x75316420] }
  0x3a   :  { %161 = vst [vmem:[#allocation1 + $0x10] ss:$2 sm:$0xff] %v729_v1 }
  0x3e   :  { %v162_v20 = vld.sshfl [vmem:[#allocation1] sm:$0xff pattern:$0x75316420]  ;;  %v163_v21 = vld.sshfl [vmem:[#allocation1 + $0x8] sm:$0xff pattern:$0x75316420] }
  0x3f   :  { %148 = vrot.lane.b32.xlu1 %v143_v19, %s696_s22  ;;  %126 = vrot.lane.b32.xlu0 %v121_v16, %s695_s21  ;;  %181 = vst [vmem:[#allocation1 + $0x1] ss:$2 sm:$0xff] %v727_v0 }
  0x41   :  { %v164_v22 = vld.sshfl [vmem:[#allocation1 + $0x10] sm:$0xff pattern:$0x75316420] }
  0x42   :  { %169 = vrot.lane.b32.xlu2 %v164_v22, %s697_s23  ;;  %183 = vst [vmem:[#allocation1 + $0x11] ss:$2 sm:$0xff] %v729_v1 }
  0x46   :  { %v185_v23 = vld.sshfl [vmem:[#allocation1 + $0x8] sm:$0xff pattern:$0x75316420]  ;;  %v184_v24 = vld.sshfl [vmem:[#allocation1] sm:$0xff pattern:$0x75316420] }
  0x47   :  { %146 = vrot.lane.b32.xlu0 %v142_v18, %s696_s22  ;;  %165 = vrot.lane.b32.xlu1 %v162_v20, %s697_s23  ;;  %202 = vst [vmem:[#allocation1] ss:$2 sm:$0xff] %v727_v0 }
  0x49   :  { %v186_v25 = vld.sshfl [vmem:[#allocation1 + $0x10] sm:$0xff pattern:$0x75316420] }
  0x4a   :  { %204 = vst [vmem:[#allocation1 + $0x10] ss:$2 sm:$0xff] %v729_v1  ;;  %187 = vrot.lane.b32.xlu2 %v184_v24, %s698_s24 }
  0x4e   :  { %v205_v27 = vld.sshfl [vmem:[#allocation1] sm:$0xff pattern:$0x75316420]  ;;  %v206_v28 = vld.sshfl [vmem:[#allocation1 + $0x8] sm:$0xff pattern:$0x75316420] }
  0x4f   :  { %191 = vrot.lane.b32.xlu0 %v186_v25, %s698_s24  ;;  %167 = vrot.lane.b32.xlu1 %v163_v21, %s697_s23  ;;  %326 = vst [vmem:[#allocation1] ss:$2 sm:$0xff] %v769_v26 }
  0x51   :  { %v207_v30 = vld.sshfl [vmem:[#allocation1 + $0x10] sm:$0xff pattern:$0x75316420] }
  0x52   :  { %189 = vrot.lane.b32.xlu2 %v185_v23, %s698_s24  ;;  %328 = vst [vmem:[#allocation1 + $0x10] ss:$2 sm:$0xff] %v774_v29 }
  0x56   :  { %v778_v31 = vld.sshfl [vmem:[#allocation1] sm:$0xff pattern:$0x75316420]  ;;  %v780_v32 = vld.sshfl [vmem:[#allocation1 + $0x8] sm:$0xff pattern:$0x75316420] }
  0x57   :  { %208 = vrot.lane.b32.xlu0 %v205_v27, %s699_s25  ;;  %339 = vst [vmem:[#allocation1 + $0x1] ss:$2 sm:$0xff] %v769_v26 }
  0x59   :  { %v784_v33 = vld.sshfl [vmem:[#allocation1 + $0x10] sm:$0xff pattern:$0x75316420] }
  0x5a   :  { %341 = vst [vmem:[#allocation1 + $0x11] ss:$2 sm:$0xff] %v774_v29  ;;  %212 = vrot.lane.b32.xlu2 %v207_v30, %s699_s25 }
  0x5e   :  { %v343_v34 = vld.sshfl [vmem:[#allocation1 + $0x8] sm:$0xff pattern:$0x75316420]  ;;  %v342_v35 = vld.sshfl [vmem:[#allocation1] sm:$0xff pattern:$0x75316420] }
  0x5f   :  { %210 = vrot.lane.b32.xlu0 %v206_v28, %s699_s25  ;;  %347 = vrot.lane.b32.xlu1 %v343_v34, %s692_s0  ;;  %359 = vst [vmem:[#allocation1] ss:$2 sm:$0xff] %v769_v26 }
  0x61   :  { %v791_v36 = vld.sshfl [vmem:[#allocation1 + $0x10] sm:$0xff pattern:$0x75316420] }
  0x62   :  { %361 = vst [vmem:[#allocation1 + $0x10] ss:$2 sm:$0xff] %v774_v29 }
  0x66   :  { %v362_v37 = vld.sshfl [vmem:[#allocation1] sm:$0xff pattern:$0x75316420]  ;;  %v363_v38 = vld.sshfl [vmem:[#allocation1 + $0x8] sm:$0xff pattern:$0x75316420] }
  0x67   :  { %345 = vrot.lane.b32.xlu0 %v342_v35, %s692_s0  ;;  %365 = vrot.lane.b32.xlu1 %v362_v37, %s693_s19  ;;  %380 = vst [vmem:[#allocation1 + $0x1] ss:$2 sm:$0xff] %v769_v26 }
  0x68   :  { %367 = vrot.lane.b32.xlu2 %v363_v38, %s693_s19 }
  0x69   :  { %v364_v39 = vld.sshfl [vmem:[#allocation1 + $0x10] sm:$0xff pattern:$0x75316420] }
  0x6a   :  { %382 = vst [vmem:[#allocation1 + $0x11] ss:$2 sm:$0xff] %v774_v29 }
  0x6e   :  { %v384_v40 = vld.sshfl [vmem:[#allocation1 + $0x8] sm:$0xff pattern:$0x75316420]  ;;  %v383_v41 = vld.sshfl [vmem:[#allocation1] sm:$0xff pattern:$0x75316420] }
  0x6f   :  { %388 = vrot.lane.b32.xlu1 %v384_v40, %s694_s20  ;;  %386 = vrot.lane.b32.xlu0 %v383_v41, %s694_s20  ;;  %400 = vst [vmem:[#allocation1] ss:$2 sm:$0xff] %v769_v26 }
  0x71   :  { %v802_v42 = vld.sshfl [vmem:[#allocation1 + $0x10] sm:$0xff pattern:$0x75316420] }
  0x72   :  { %402 = vst [vmem:[#allocation1 + $0x10] ss:$2 sm:$0xff] %v774_v29 }
  0x76   :  { %v404_v43 = vld.sshfl [vmem:[#allocation1 + $0x8] sm:$0xff pattern:$0x75316420]  ;;  %v403_v44 = vld.sshfl [vmem:[#allocation1] sm:$0xff pattern:$0x75316420] }
  0x77   :  { %408 = vrot.lane.b32.xlu0 %v404_v43, %s695_s21  ;;  %406 = vrot.lane.b32.xlu2 %v403_v44, %s695_s21  ;;  %421 = vst [vmem:[#allocation1 + $0x1] ss:$2 sm:$0xff] %v769_v26 }
  0x79   :  { %v405_v45 = vld.sshfl [vmem:[#allocation1 + $0x10] sm:$0xff pattern:$0x75316420] }
  0x7a   :  { %423 = vst [vmem:[#allocation1 + $0x11] ss:$2 sm:$0xff] %v774_v29  ;;  %v82_v51 = vpop.permute.xlu2 %81 }
  0x7e   :  { %v425_v46 = vld.sshfl [vmem:[#allocation1 + $0x8] sm:$0xff pattern:$0x75316420]  ;;  %v424_v47 = vld.sshfl [vmem:[#allocation1] sm:$0xff pattern:$0x75316420] }
  0x7f   :  { %429 = vrot.lane.b32.xlu2 %v425_v46, %s696_s22  ;;  %427 = vrot.lane.b32.xlu1 %v424_v47, %s696_s22  ;;  %441 = vst [vmem:[#allocation1] ss:$2 sm:$0xff] %v769_v26 }
  0x81   :  { %v426_v48 = vld.sshfl [vmem:[#allocation1 + $0x10] sm:$0xff pattern:$0x75316420] }
  0x82   :  { %443 = vst [vmem:[#allocation1 + $0x10] ss:$2 sm:$0xff] %v774_v29 }
  0x86   :  { %v445_v49 = vld.sshfl [vmem:[#allocation1 + $0x8] sm:$0xff pattern:$0x75316420]  ;;  %v444_v50 = vld.sshfl [vmem:[#allocation1] sm:$0xff pattern:$0x75316420] }
  0x87   :  { %449 = vrot.lane.b32.xlu0 %v445_v49, %s697_s23  ;;  %447 = vrot.lane.b32.xlu2 %v444_v50, %s697_s23  ;;  %462 = vst [vmem:[#allocation1 + $0x1] ss:$2 sm:$0xff] %v769_v26 }
  0x89   :  { %v60_v52 = vpop.permute.xlu1 %59  ;;  %v58_v53 = vpop.permute.xlu0 %57  ;;  %v446_v54 = vld.sshfl [vmem:[#allocation1 + $0x10] sm:$0xff pattern:$0x75316420] }
  0x8a   :  { %v64_v55 = vsel %vm63_vm1, %v58_v53, %v60_v52  ;;  %464 = vst [vmem:[#allocation1 + $0x11] ss:$2 sm:$0xff] %v774_v29 }
  0x8b   :  { %69 = vst [vmem:[#allocation2] sm:$0xf0] %v64_v55 }
  0x8e   :  { %v465_v56 = vld.sshfl [vmem:[#allocation1] sm:$0xff pattern:$0x75316420]  ;;  %v466_v57 = vld.sshfl [vmem:[#allocation1 + $0x8] sm:$0xff pattern:$0x75316420] }
  0x8f   :  { %451 = vrot.lane.b32.xlu2 %v446_v54, %s697_s23  ;;  %468 = vrot.lane.b32.xlu1 %v465_v56, %s698_s24  ;;  %482 = vst [vmem:[#allocation1] ss:$2 sm:$0xff] %v769_v26 }
  0x91   :  { %v467_v58 = vld.sshfl [vmem:[#allocation1 + $0x10] sm:$0xff pattern:$0x75316420]  ;;  %v62_v59 = vpop.permute.xlu0 %61  ;;  %v80_v60 = vpop.permute.xlu1 %79 }
  0x92   :  { %472 = vrot.lane.b32.xlu0 %v467_v58, %s698_s24  ;;  %484 = vst [vmem:[#allocation1 + $0x10] ss:$2 sm:$0xff] %v774_v29  ;;  %v65_v61 = vsel %vm63_vm1, %v60_v52, %v62_v59  ;;  %v86_v62 = vsel %vm85_vm2, %v80_v60, %v82_v51  ;;  %v145_v63 = vpop.permute.xlu2 %144  ;;  %v828_v1 = vld [vmem:[#allocation2] sm:$0xff] }
  0x93   :  { %70 = vst [vmem:[#allocation2 + $0x8] sm:$0xf0] %v65_v61 }
  0x94   :  { %72 = vst.msk [vmem:[#allocation2 + $0x10] sm:$0xf0] %vm71_vm3, %v62_v59 }
  0x95   :  { %91 = vst [vmem:[#allocation2 + $0x18] sm:$0xf] %v86_v62 }
  0x96   :  { %v485_v0 = vld.sshfl [vmem:[#allocation1] sm:$0xff pattern:$0x75316420]  ;;  %335 = vst [vmem:[#allocation2] sm:$0xf] %v778_v31 }
  0x97   :  { %470 = vrot.lane.b32.xlu2 %v466_v57, %s698_s24  ;;  %488 = vrot.lane.b32.xlu1 %v485_v0, %s699_s25  ;;  %v486_v12 = vld.sshfl [vmem:[#allocation1 + $0x8] sm:$0xff pattern:$0x75316420] }
  0x99   :  { %v84_v2 = vpop.permute.xlu0 %83  ;;  %v104_v3 = vpop.permute.xlu1 %103  ;;  %v487_v17 = vld.sshfl [vmem:[#allocation1 + $0x10] sm:$0xff pattern:$0x75316420] }
  0x9a   :  { %369 = vrot.lane.b32.xlu0 %v364_v39, %s693_s19  ;;  %v87_v4 = vsel %vm85_vm2, %v82_v51, %v84_v2  ;;  %93 = vst.msk [vmem:[#allocation2 + $0x28] sm:$0xf] %vm48_vm0, %v84_v2  ;;  %v841_v7 = vld [vmem:[#allocation2 + $0x8] sm:$0xff] }
  0x9b   :  { %92 = vst [vmem:[#allocation2 + $0x20] sm:$0xf] %v87_v4  ;;  %v836_v5 = vld [vmem:[#allocation2 + $0x10] sm:$0xff] }
  0x9c   :  { %v170_v6 = vpop.permute.xlu2 %169  ;;  %337 = vst.msk [vmem:[#allocation2 + $0x10] sm:$0xf] %vm48_vm0, %v784_v33 }
  0x9d   :  { %179 = vst.msk [vmem:[#allocation2 + $0x58] sm:$0xf] %vm48_vm0, %v170_v6 }
  0x9e   :  { %336 = vst [vmem:[#allocation2 + $0x8] sm:$0xf] %v780_v32 }
  0x9f   :  { %431 = vrot.lane.b32.xlu2 %v426_v48, %s696_s22  ;;  %410 = vrot.lane.b32.xlu1 %v405_v45, %s695_s21 }
  0xa1   :  { %v106_v8 = vpop.permute.xlu1 %105  ;;  %v102_v9 = vpop.permute.xlu0 %101 }
  0xa2   :  { %v109_v10 = vsel %vm107_vm4, %v104_v3, %v106_v8  ;;  %115 = vst.msk [vmem:[#allocation2 + $0x28] sm:$0xf0] %vm71_vm3, %v106_v8  ;;  %v108_v11 = vsel %vm107_vm4, %v102_v9, %v104_v3  ;;  %v897_v8 = vld [vmem:[%s938_s1] sm:$0xff] }
  0xa3   :  { %114 = vst [vmem:[#allocation2 + $0x20] sm:$0xf0] %v109_v10 }
  0xa4   :  { %113 = vst [vmem:[#allocation2 + $0x18] sm:$0xf0] %v108_v11  ;;  %v188_v13 = vpop.permute.xlu2 %187 }
  0xa7   :  { %490 = vrot.lane.b32.xlu2 %v486_v12, %s699_s25  ;;  %390 = vrot.lane.b32.xlu1 %v802_v42, %s694_s20 }
  0xa9   :  { %v125_v14 = vpop.permute.xlu1 %124  ;;  %v123_v15 = vpop.permute.xlu0 %122  ;;  %v228_v38 = vld [vmem:[#allocation2 + $0x28] sm:$0xff] }
  0xaa   :  { %v129_v16 = vsel %vm128_vm5, %v123_v15, %v125_v14  ;;  %v227_v56 = vld [vmem:[#allocation2 + $0x20] sm:$0xff]  ;;  %v700_v15 = vmov 0  }
  0xab   :  { %134 = vst [vmem:[#allocation2 + $0x30] sm:$0xf] %v129_v16  ;;  %v226_v50 = vld [vmem:[#allocation2 + $0x18] sm:$0xff]  ;;  %636 = vset.pattern.permute.xlu0 %v700_v15 }
  0xac   :  { %v190_v18 = vpop.permute.xlu2 %189 }
  0xad   :  { %v194_v19 = vsel %vm193_vm6, %v188_v13, %v190_v18 }
  0xae   :  { %199 = vst [vmem:[#allocation2 + $0x48] sm:$0xf0] %v194_v19 }
  0xaf   :  { %492 = vrot.lane.b32.xlu2 %v487_v17, %s699_s25 }
  0xb1   :  { %v149_v20 = vpop.permute.xlu1 %148  ;;  %v127_v21 = vpop.permute.xlu0 %126 }
  0xb2   :  { %158 = vst.msk [vmem:[#allocation2 + $0x40] sm:$0xf0] %vm71_vm3, %v149_v20  ;;  %v130_v22 = vsel %vm128_vm5, %v125_v14, %v127_v21  ;;  %v32_v14 = vld [vmem:[%s939_s2] sm:$0xff]  ;;  %s701_s2 = smov [#allocation6]  }
  0xb3   :  { %135 = vst [vmem:[#allocation2 + $0x38] sm:$0xf] %v130_v22  ;;  %240 = vperm.xlu0 %636, %v32_v14   ;;  %s594_s29 = sshll.u32 %s701_s2, 4  ;;  %s595_s29 = int_to_ptr.vmem [resolvable:$true] %s594_s29 }
  0xb4   :  { %136 = vst.msk [vmem:[#allocation2 + $0x40] sm:$0xf] %vm48_vm0, %v127_v21  ;;  %v213_v23 = vpop.permute.xlu2 %212 }
  0xb5   :  { %222 = vst.msk [vmem:[#allocation2 + $0x70] sm:$0xf] %vm48_vm0, %v213_v23 }
  0xb7   :  { %349 = vrot.lane.b32.xlu2 %v791_v36, %s692_s0 }
  0xb9   :  { %v147_v24 = vpop.permute.xlu0 %146  ;;  %v166_v25 = vpop.permute.xlu1 %165 }
  0xba   :  { %v151_v26 = vsel %vm150_vm7, %v145_v63, %v147_v24  ;;  %v152_v27 = vsel %vm150_vm7, %v147_v24, %v149_v20 }
  0xbb   :  { %156 = vst [vmem:[#allocation2 + $0x30] sm:$0xf0] %v151_v26  ;;  %v231_v37 = vld [vmem:[#allocation2 + $0x40] sm:$0xff] }
  0xbc   :  { %157 = vst [vmem:[#allocation2 + $0x38] sm:$0xf0] %v152_v27  ;;  %v237_v28 = vld [vmem:[#allocation2 + $0x70] sm:$0xf] }
  0xbd   :  { %613 = vmatpush.msk.msra.mxu2 %vm247_vm8, %v237_v28 }
  0xc1   :  { %v192_v29 = vpop.permute.xlu0 %191  ;;  %v168_v30 = vpop.permute.xlu1 %167 }
  0xc2   :  { %v195_v31 = vsel %vm193_vm6, %v190_v18, %v192_v29  ;;  %201 = vst.msk [vmem:[#allocation2 + $0x58] sm:$0xf0] %vm71_vm3, %v192_v29  ;;  %v172_v32 = vsel %vm171_vm9, %v166_v25, %v168_v30  ;;  %v173_v33 = vsel %vm171_vm9, %v168_v30, %v170_v6  ;;  %v868_v34 = vpop.permute.xlu2 %367  ;;  %v229_v54 = vld [vmem:[#allocation2 + $0x30] sm:$0xff] }
  0xc3   :  { %200 = vst [vmem:[#allocation2 + $0x50] sm:$0xf0] %v195_v31  ;;  %v230_v55 = vld [vmem:[#allocation2 + $0x38] sm:$0xff] }
  0xc4   :  { %177 = vst [vmem:[#allocation2 + $0x48] sm:$0xf] %v172_v32 }
  0xc5   :  { %178 = vst [vmem:[#allocation2 + $0x50] sm:$0xf] %v173_v33 }
  0xc9   :  { %v209_v35 = vpop.permute.xlu0 %208  ;;  %v234_v36 = vld [vmem:[#allocation2 + $0x58] sm:$0xff] }
  0xca   :  { %309 = vmatpush.msra.mxu2 %v234_v36 }
  0xcb   :  { %v232_v52 = vld [vmem:[#allocation2 + $0x48] sm:$0xff] }
  0xcc   :  { %310 = vmatpush.msra.mxu2 %v231_v37  ;;  %v233_v53 = vld [vmem:[#allocation2 + $0x50] sm:$0xff] }
  0xce   :  { %311 = vmatpush.msra.mxu2 %v228_v38 }
  0xd0   :  { %312 = vmatpush.msra.mxu2 %v836_v5 }
  0xd1   :  { %v211_v39 = vpop.permute.xlu0 %210  ;;  %v871_v40 = vpop.permute.xlu1 %347  ;;  %614 = vmatmul.msk.f32.vlgmr.msra.gmra.mxu2 %vm243_vm11, %v897_v8 }
  0xd2   :  { %v215_v41 = vsel %vm214_vm10, %v209_v35, %v211_v39  ;;  %v216_v42 = vsel %vm214_vm10, %v211_v39, %v213_v23  ;;  %v407_v43 = vpop.permute.xlu2 %406 }
  0xd3   :  { %220 = vst [vmem:[#allocation2 + $0x60] sm:$0xf] %v215_v41 }
  0xd4   :  { %221 = vst [vmem:[#allocation2 + $0x68] sm:$0xf] %v216_v42 }
  0xd9   :  { %v346_v44 = vpop.permute.xlu0 %345  ;;  %v366_v45 = vpop.permute.xlu1 %365 }
  0xda   :  { %v351_v46 = vsel %vm63_vm1, %v346_v44, %v871_v40  ;;  %v371_v47 = vsel %vm85_vm2, %v366_v45, %v868_v34  ;;  %v430_v48 = vpop.permute.xlu2 %429  ;;  %v235_v49 = vld [vmem:[#allocation2 + $0x60] sm:$0xf] }
  0xdb   :  { %609 = vmatpush.msk.msra.mxu0 %vm247_vm8, %v235_v49  ;;  %v236_v51 = vld [vmem:[#allocation2 + $0x68] sm:$0xf]  ;;  %376 = vst [vmem:[#allocation2 + $0x18] sm:$0xf] %v371_v47 }
  0xdc   :  { %611 = vmatpush.msk.msra.mxu1 %vm247_vm8, %v236_v51  ;;  %356 = vst [vmem:[#allocation2] sm:$0xf0] %v351_v46 }
  0xdd   :  { %269 = vmatpush.msra.mxu0 %v232_v52 }
  0xde   :  { %289 = vmatpush.msra.mxu1 %v233_v53 }
  0xdf   :  { %270 = vmatpush.msra.mxu0 %v229_v54 }
  0xe0   :  { %290 = vmatpush.msra.mxu1 %v230_v55 }
  0xe1   :  { %271 = vmatpush.msra.mxu0 %v226_v50  ;;  %v881_v57 = vpop.permute.xlu1 %388  ;;  %v387_v58 = vpop.permute.xlu0 %386 }
  0xe2   :  { %291 = vmatpush.msra.mxu1 %v227_v56  ;;  %v392_v59 = vsel %vm107_vm4, %v387_v58, %v881_v57  ;;  %v448_v60 = vpop.permute.xlu2 %447 }
  0xe3   :  { %397 = vst [vmem:[#allocation2 + $0x18] sm:$0xf0] %v392_v59  ;;  %272 = vmatpush.msra.mxu0 %v828_v1  ;;  %v502_v38 = vld [vmem:[#allocation2] sm:$0xff] }
  0xe4   :  { %292 = vmatpush.msra.mxu1 %v841_v7  ;;  %610 = vmatmul.msk.f32.vlgmr.msra.gmra.mxu0 %vm243_vm11, %v897_v8 }
  0xe5   :  { %612 = vmatmul.msk.f32.vlgmr.msra.gmra.mxu1 %vm243_vm11, %v897_v8 }
  0xe9   :  { %v409_v61 = vpop.permute.xlu0 %408 }
  0xea   :  { %v412_v62 = vsel %vm128_vm5, %v407_v43, %v409_v61  ;;  %v452_v63 = vpop.permute.xlu2 %451  ;;  %v505_v36 = vld [vmem:[#allocation2 + $0x18] sm:$0xff] }
  0xeb   :  { %417 = vst [vmem:[#allocation2 + $0x30] sm:$0xf] %v412_v62 }
  0xec   :  { %460 = vst.msk [vmem:[#allocation2 + $0x58] sm:$0xf] %vm48_vm0, %v452_v63 }
  0xf1   :  { %v428_v0 = vpop.permute.xlu1 %427 }
  0xf2   :  { %v433_v2 = vsel %vm150_vm7, %v428_v0, %v430_v48  ;;  %v471_v3 = vpop.permute.xlu2 %470 }
  0xf3   :  { %438 = vst [vmem:[#allocation2 + $0x30] sm:$0xf0] %v433_v2 }
  0xf9   :  { %v450_v4 = vpop.permute.xlu0 %449 }
  0xfa   :  { %v453_v5 = vsel %vm171_vm9, %v448_v60, %v450_v4  ;;  %v454_v6 = vsel %vm171_vm9, %v450_v4, %v452_v63  ;;  %v432_v1 = vpop.permute.xlu2 %431 }
  0xfb   :  { %458 = vst [vmem:[#allocation2 + $0x48] sm:$0xf] %v453_v5  ;;  %v434_v7 = vsel %vm150_vm7, %v430_v48, %v432_v1 }
  0xfc   :  { %459 = vst [vmem:[#allocation2 + $0x50] sm:$0xf] %v454_v6 }
  0xfd   :  { %439 = vst [vmem:[#allocation2 + $0x38] sm:$0xf0] %v434_v7 }
  0xfe   :  { %440 = vst.msk [vmem:[#allocation2 + $0x40] sm:$0xf0] %vm71_vm3, %v432_v1 }
 0x101   :  { %v469_v9 = vpop.permute.xlu1 %468 }
 0x102   :  { %v474_v10 = vsel %vm193_vm6, %v469_v9, %v471_v3  ;;  %v491_v11 = vpop.permute.xlu2 %490 }
 0x103   :  { %479 = vst [vmem:[#allocation2 + $0x48] sm:$0xf0] %v474_v10 }
 0x104   :  { %v473_v12 = vpop.permute.xlu0 %472 }
 0x105   :  { %v475_v13 = vsel %vm193_vm6, %v471_v3, %v473_v12  ;;  %481 = vst.msk [vmem:[#allocation2 + $0x58] sm:$0xf0] %vm71_vm3, %v473_v12 }
 0x106   :  { %480 = vst [vmem:[#allocation2 + $0x50] sm:$0xf0] %v475_v13 }
 0x109   :  { %v489_v16 = vpop.permute.xlu1 %488 }
 0x10a   :  { %v493_v17 = vpop.permute.xlu2 %492  ;;  %v494_v20 = vsel %vm214_vm10, %v489_v16, %v491_v11  ;;  %v511_v31 = vld [vmem:[#allocation2 + $0x48] sm:$0xff] }
 0x10b   :  { %v495_v18 = vsel %vm214_vm10, %v491_v11, %v493_v17  ;;  %501 = vst.msk [vmem:[#allocation2 + $0x70] sm:$0xf] %vm48_vm0, %v493_v17 }
 0x10c   :  { %v370_v19 = vpop.permute.xlu0 %369  ;;  %500 = vst [vmem:[#allocation2 + $0x68] sm:$0xf] %v495_v18  ;;  %v513_v28 = vld [vmem:[#allocation2 + $0x58] sm:$0xff] }
 0x10d   :  { %v372_v21 = vsel %vm85_vm2, %v868_v34, %v370_v19  ;;  %378 = vst.msk [vmem:[#allocation2 + $0x28] sm:$0xf] %vm48_vm0, %v370_v19  ;;  %v512_v29 = vld [vmem:[#allocation2 + $0x50] sm:$0xff] }
 0x10e   :  { %377 = vst [vmem:[#allocation2 + $0x20] sm:$0xf] %v372_v21  ;;  %v508_v34 = vld [vmem:[#allocation2 + $0x30] sm:$0xff] }
 0x10f   :  { %499 = vst [vmem:[#allocation2 + $0x60] sm:$0xf] %v494_v20 }
 0x111   :  { %v411_v22 = vpop.permute.xlu1 %410 }
 0x112   :  { %v350_v23 = vpop.permute.xlu2 %349  ;;  %v413_v24 = vsel %vm128_vm5, %v409_v61, %v411_v22  ;;  %419 = vst.msk [vmem:[#allocation2 + $0x40] sm:$0xf] %vm48_vm0, %v411_v22  ;;  %v516_v25 = vld [vmem:[#allocation2 + $0x70] sm:$0xf] }
 0x113   :  { %v352_v26 = vsel %vm63_vm1, %v871_v40, %v350_v23  ;;  %358 = vst.msk [vmem:[#allocation2 + $0x10] sm:$0xf0] %vm71_vm3, %v350_v23  ;;  %619 = vmatpush.msk.msrb.mxu1 %vm247_vm8, %v516_v25  ;;  %v515_v27 = vld [vmem:[#allocation2 + $0x68] sm:$0xf] }
 0x114   :  { %357 = vst [vmem:[#allocation2 + $0x8] sm:$0xf0] %v352_v26  ;;  %617 = vmatpush.msk.msrb.mxu0 %vm247_vm8, %v515_v27 }
 0x115   :  { %418 = vst [vmem:[#allocation2 + $0x38] sm:$0xf] %v413_v24  ;;  %578 = vmatpush.msrb.mxu1 %v513_v28 }
 0x116   :  { %v514_v30 = vld [vmem:[#allocation2 + $0x60] sm:$0xf]  ;;  %558 = vmatpush.msrb.mxu0 %v512_v29 }
 0x117   :  { %615 = vmatpush.msk.msra.mxu3 %vm247_vm8, %v514_v30 }
 0x119   :  { %538 = vmatpush.msra.mxu3 %v511_v31  ;;  %v391_v32 = vpop.permute.xlu1 %390  ;;  %v510_v33 = vld [vmem:[#allocation2 + $0x40] sm:$0xff] }
 0x11a   :  { %v393_v35 = vsel %vm107_vm4, %v881_v57, %v391_v32  ;;  %399 = vst.msk [vmem:[#allocation2 + $0x28] sm:$0xf0] %vm71_vm3, %v391_v32  ;;  %579 = vmatpush.msrb.mxu1 %v510_v33  ;;  %v504_v40 = vld [vmem:[#allocation2 + $0x10] sm:$0xff] }
 0x11b   :  { %539 = vmatpush.msra.mxu3 %v508_v34  ;;  %398 = vst [vmem:[#allocation2 + $0x20] sm:$0xf0] %v393_v35  ;;  %v503_v42 = vld [vmem:[#allocation2 + $0x8] sm:$0xff] }
 0x11c   :  { %v509_v37 = vld [vmem:[#allocation2 + $0x38] sm:$0xff] }
 0x11d   :  { %540 = vmatpush.msra.mxu3 %v505_v36  ;;  %559 = vmatpush.msrb.mxu0 %v509_v37 }
 0x11f   :  { %541 = vmatpush.msra.mxu3 %v502_v38 }
 0x120   :  { %616 = vmatmul.msk.f32.vlgmr.msra.gmra.mxu3 %vm243_vm11, %v897_v8 }
 0x121   :  { %v507_v39 = vld [vmem:[#allocation2 + $0x28] sm:$0xff] }
 0x122   :  { %580 = vmatpush.msrb.mxu1 %v507_v39  ;;  %v506_v41 = vld [vmem:[#allocation2 + $0x20] sm:$0xff] }
 0x123   :  { %560 = vmatpush.msrb.mxu0 %v506_v41 }
 0x124   :  { %581 = vmatpush.msrb.mxu1 %v504_v40 }
 0x125   :  { %561 = vmatpush.msrb.mxu0 %v503_v42  ;;  %620 = vmatmul.msk.f32.vlgmr.msrb.gmra.mxu1 %vm243_vm11, %v897_v8  ;;  %v241_v43 = vpop.permute.xlu0 %240 }
 0x126   :  { %618 = vmatmul.msk.f32.vlgmr.msrb.gmra.mxu0 %vm243_vm11, %v897_v8 }
 0x154   :  { %v314_v48 = vpop.f32.mrf.mxu2 }
 0x155   :  { %v315_v49 = vadd.f32 %v314_v48, %v241_v43 }
 0x157   :  { %320 = vst.msk [vmem:[#allocation6 + $0x10] sm:$0xff] %vm319_vm12, %v315_v49 }
 0x161   :  { %v274_v44 = vpop.f32.mrf.mxu0 }
 0x162   :  { %v294_v45 = vpop.f32.mrf.mxu1  ;;  %v275_v46 = vadd.f32 %v274_v44, %v241_v43 }
 0x163   :  { %v295_v47 = vadd.f32 %v294_v45, %v241_v43 }
 0x164   :  { %317 = vst [vmem:[#allocation6] sm:$0xff] %v275_v46 }
 0x165   :  { %318 = vst [vmem:[#allocation6 + $0x8] sm:$0xff] %v295_v47 }
 0x1a2   :  { %v583_v50 = vpop.f32.mrf.mxu1 }
 0x1a3   :  { %v543_v51 = vpop.f32.mrf.mxu3  ;;  %v563_v52 = vpop.f32.mrf.mxu0  ;;  %v584_v53 = vadd.f32 %v583_v50, %v241_v43 }
 0x1a4   :  { %v544_v54 = vadd.f32 %v543_v51, %v241_v43  ;;  %v564_v55 = vadd.f32 %v563_v52, %v241_v43 }
 0x1a5   :  { %589 = vst.msk [vmem:[#allocation6 + $0x28] sm:$0xff] %vm319_vm12, %v584_v53 }
 0x1a6   :  { %587 = vst [vmem:[#allocation6 + $0x18] sm:$0xff] %v544_v54 }
 0x1a7   :  { %588 = vst [vmem:[#allocation6 + $0x20] sm:$0xff] %v564_v55 }
 0x1a8   :  { %602 = dma.vmem_to_hbm [thread:$0]  %s595_s29, 768, %s597_s5, [#allocation5], %s702_s6, %s702_s6, %s703_s7  }
 0x1a9   :  { %687 = dma.done.wait [#allocation5], 768  }
 0x1aa   :  { %688 = vsyncadd [#allocation5], 4294966528 }
 0x1ab   :  { %607 = vsyncpa [#allocation4], 1 }
 0x1ac   :  { %608 = vsyncpa [#allocation5], 1 }

</bundles_post_ra>
